<compile_context>
chip_gen: v6e
topology: v6e:2x2x1
jax: 0.10.0
libtpu: 0.0.40
codegen_flags: <defaults>
</compile_context>

<pallas_src>
import functools

import jax
import jax.numpy as jnp
from jax import lax
from jax.experimental import pallas as pl
from jax.experimental.pallas import tpu as pltpu


# ----------------------------------------------------------------------
# Kernel A: table resident in VMEM, in-kernel row gather.
# ----------------------------------------------------------------------
def _embedding_vmem_kernel(ids_smem, table_ref, out_ref, *, token_block):
    """ids_smem: (N_pad,) int32 in SMEM; table_ref: (V, D) in VMEM (resident);
    out_ref: (token_block, D) output block in VMEM."""
    base = pl.program_id(0) * token_block

    def body(j, carry):
        row = ids_smem[base + j]                     # cheap SMEM scalar read
        out_ref[pl.ds(j, 1), :] = table_ref[pl.ds(row, 1), :]
        return carry

    lax.fori_loop(0, token_block, body, 0, unroll=min(8, token_block))


# ----------------------------------------------------------------------
# Kernel B: table in HBM, windowed row-DMA gather (semaphore ring).
# ----------------------------------------------------------------------
def _embedding_hbm_kernel(ids_smem, table_hbm, out_ref, copy_sems, *,
                          token_block, window):
    """ids_smem: (N_pad,) int32 in SMEM; table_hbm: (V, D) left in HBM;
    out_ref: (token_block, D) output block; copy_sems: (window,) DMA sems."""
    base = pl.program_id(0) * token_block

    def row_copy(j):
        # Reconstruct the full descriptor (same src/dst/sem) for start AND wait.
        row = ids_smem[base + j]
        return pltpu.make_async_copy(
            table_hbm.at[pl.ds(row, 1), :],
            out_ref.at[pl.ds(j, 1), :],
            copy_sems.at[j % window],
        )

    # Prime the in-flight window (static, small).
    for j in range(min(window, token_block)):
        row_copy(j).start()

    def body(j, carry):
        # Wait for row j, then immediately reuse its semaphore slot for j+window.
        row_copy(j).wait()

        @pl.when(j + window < token_block)
        def _():
            row_copy(j + window).start()

        return carry

    lax.fori_loop(0, token_block, body, 0, unroll=4)


# ----------------------------------------------------------------------
# Wrapper.
# ----------------------------------------------------------------------
def _round_up(x, m):
    return ((x + m - 1) // m) * m


def _vmem_capacity_bytes():
    try:
        return int(pltpu.get_tpu_info().vmem_capacity_bytes)
    except Exception:
        return 64 * 1024 * 1024  # conservative fallback (v7x per-TensorCore VMEM)


def embedding_lookup(token_ids, table, *, token_block=256, dma_window=8):
    """Pallas equivalent of nn.Embedding(vocab, model_dim)(token_ids)."""
    V, D = table.shape
    itemsize = jnp.dtype(table.dtype).itemsize
    orig_shape = token_ids.shape

    # Flatten and clamp ids (matches jnp/XLA gather clamping for OOB ids).
    ids = jnp.clip(token_ids.reshape(-1).astype(jnp.int32), 0, V - 1)
    n = ids.shape[0]

    # ---- per-generation VMEM budgeting --------------------------------
    vmem_cap = _vmem_capacity_bytes()                 # 64 MiB v7x, 128 MiB v5e/v6e
    vmem_limit = min(int(0.75 * vmem_cap), vmem_cap - (16 << 20))
    table_bytes = V * D * itemsize
    table_resident = table_bytes <= vmem_cap // 4     # ~16 MiB v7x, ~32 MiB v5e/v6e

    # ---- choose the token block (lane-dense (tb, D) output slabs) ------
    n8 = _round_up(n, 8)
    tb = min(_round_up(token_block, 8), n8)
    # Keep >= 2 grid steps when there is enough work so both v7x cores help.
    if tb == n8 and n8 >= 16:
        tb = max(8, (n8 // 2) // 8 * 8)
    # Fit the double-buffered output block (+ resident table) in the VMEM limit.
    out_budget = vmem_limit - (table_bytes if table_resident else 0) - (2 << 20)
    while tb > 8 and 2 * tb * D * itemsize > out_budget:
        tb = max(8, (tb // 2) // 8 * 8)

    n_pad = _round_up(n, tb)
    if n_pad != n:
        # TODO(synk): ragged tail is padded with id 0 and sliced off afterwards;
        # choosing batch*seq divisible by token_block avoids this extra copy.
        ids = jnp.pad(ids, (0, n_pad - n))
    grid = (n_pad // tb,)

    out_spec = pl.BlockSpec((tb, D), lambda i, ids_ref: (i, 0))
    compiler_params = pltpu.CompilerParams(
        dimension_semantics=("parallel",),            # v7x: both TCs split tokens
        vmem_limit_bytes=vmem_limit,
    )

    if table_resident:
        kernel = functools.partial(_embedding_vmem_kernel, token_block=tb)
        grid_spec = pltpu.PrefetchScalarGridSpec(
            num_scalar_prefetch=1,                    # token ids -> SMEM
            grid=grid,
            # Full table, constant block index -> DMA'd once, resident across grid.
            in_specs=[pl.BlockSpec((V, D), lambda i, ids_ref: (0, 0))],
            out_specs=out_spec,
        )
    else:
        window = max(1, min(dma_window, tb))
        kernel = functools.partial(_embedding_hbm_kernel, token_block=tb,
                                   window=window)
        grid_spec = pltpu.PrefetchScalarGridSpec(
            num_scalar_prefetch=1,
            grid=grid,
            in_specs=[pl.BlockSpec(memory_space=pl.ANY)],   # table stays in HBM
            out_specs=out_spec,
            scratch_shapes=[pltpu.SemaphoreType.DMA((window,))],
        )

    out = pl.pallas_call(
        kernel,
        out_shape=jax.ShapeDtypeStruct((n_pad, D), table.dtype),
        grid_spec=grid_spec,
        compiler_params=compiler_params,
    )(ids, table)

    if n_pad != n:
        out = out[:n]
    return out.reshape(*orig_shape, D)


# ------------------------- pure-JAX reference --------------------------
def embedding_ref(token_ids, table):
    return table[token_ids]


# ------------------------------ main -----------------------------------
if __name__ == "__main__":
    # Small shapes consistent with the module; model_dim=128 keeps the output
    # lane-dense (full-width, unmasked stores), vocab_size=256 keeps the table
    # tiny (it takes the VMEM-resident fast path).
    vocab_size, model_dim = 256, 128
    batch, seq = 2, 8

    key = jax.random.PRNGKey(0)
    k_ids, k_tbl = jax.random.split(key)
    token_ids = jax.random.randint(k_ids, (batch, seq), 0, vocab_size,
                                   dtype=jnp.int32)
    # nn.Embedding default init: weight ~ N(0, 1)
    table = jax.random.normal(k_tbl, (vocab_size, model_dim), jnp.float32)

    out = embedding_lookup(token_ids, table)
    out = jax.block_until_ready(out)

    ref = embedding_ref(token_ids, table)
    assert out.shape == (batch, seq, model_dim)
    # Gather is a pure copy -> results must be bit-exact.
    assert jnp.array_equal(out, ref), "mismatch vs reference embedding lookup"

    print("KERNEL_OK")
</pallas_src>

<mosaic_0001>
module attributes {stable_mosaic.version = 11 : i64} {
  func.func @_embedding_vmem_kernel(%arg0: i32, %arg1: memref<16xi32, #tpu.memory_space<smem>>, %arg2: memref<256x128xf32, #tpu.memory_space<vmem>>, %arg3: memref<8x128xf32, #tpu.memory_space<vmem>>) attributes {dimension_semantics = [#tpu.dimension_semantics<parallel>], iteration_bounds = array<i64: 2>, scalar_prefetch = 1 : i64, scratch_operands = 0 : i64, tpu.core_type = #tpu.core_type<tc>, window_params = [{pipeline_mode = #tpu.pipeline_mode<synchronous>, transform_indices = @transform_0, window_bounds = array<i64: 256, 128>}, {transform_indices = @transform_1, window_bounds = array<i64: 8, 128>}]} {
    %c8_i32 = arith.constant 8 : i32
    %0 = arith.muli %arg0, %c8_i32 : i32
    %c0_i32 = arith.constant 0 : i32
    %1 = arith.addi %0, %c0_i32 : i32
    %2 = arith.index_cast %1 : i32 to index
    %3 = memref.load %arg1[%2] : memref<16xi32, #tpu.memory_space<smem>>
    %4 = arith.index_cast %3 : i32 to index
    %c0 = arith.constant 0 : index
    %5 = vector.load %arg2[%4, %c0] : memref<256x128xf32, #tpu.memory_space<vmem>>, vector<1x128xf32>
    %6 = arith.index_cast %c0_i32 : i32 to index
    %c0_0 = arith.constant 0 : index
    %7 = vector.load %arg3[%6, %c0_0] : memref<8x128xf32, #tpu.memory_space<vmem>>, vector<1x128xf32>
    tpu.vector_store %arg3[%6, %c0_0], %5 {strides = array<i32>} : memref<8x128xf32, #tpu.memory_space<vmem>>, vector<1x128xf32>,
    %c1_i32 = arith.constant 1 : i32
    %8 = arith.addi %0, %c1_i32 : i32
    %9 = arith.index_cast %8 : i32 to index
    %10 = memref.load %arg1[%9] : memref<16xi32, #tpu.memory_space<smem>>
    %11 = arith.index_cast %10 : i32 to index
    %c0_1 = arith.constant 0 : index
    %12 = vector.load %arg2[%11, %c0_1] : memref<256x128xf32, #tpu.memory_space<vmem>>, vector<1x128xf32>
    %13 = arith.index_cast %c1_i32 : i32 to index
    %c0_2 = arith.constant 0 : index
    %14 = vector.load %arg3[%13, %c0_2] : memref<8x128xf32, #tpu.memory_space<vmem>>, vector<1x128xf32>
    tpu.vector_store %arg3[%13, %c0_2], %12 {strides = array<i32>} : memref<8x128xf32, #tpu.memory_space<vmem>>, vector<1x128xf32>,
    %c2_i32 = arith.constant 2 : i32
    %15 = arith.addi %0, %c2_i32 : i32
    %16 = arith.index_cast %15 : i32 to index
    %17 = memref.load %arg1[%16] : memref<16xi32, #tpu.memory_space<smem>>
    %18 = arith.index_cast %17 : i32 to index
    %c0_3 = arith.constant 0 : index
    %19 = vector.load %arg2[%18, %c0_3] : memref<256x128xf32, #tpu.memory_space<vmem>>, vector<1x128xf32>
    %20 = arith.index_cast %c2_i32 : i32 to index
    %c0_4 = arith.constant 0 : index
    %21 = vector.load %arg3[%20, %c0_4] : memref<8x128xf32, #tpu.memory_space<vmem>>, vector<1x128xf32>
    tpu.vector_store %arg3[%20, %c0_4], %19 {strides = array<i32>} : memref<8x128xf32, #tpu.memory_space<vmem>>, vector<1x128xf32>,
    %c3_i32 = arith.constant 3 : i32
    %22 = arith.addi %0, %c3_i32 : i32
    %23 = arith.index_cast %22 : i32 to index
    %24 = memref.load %arg1[%23] : memref<16xi32, #tpu.memory_space<smem>>
    %25 = arith.index_cast %24 : i32 to index
    %c0_5 = arith.constant 0 : index
    %26 = vector.load %arg2[%25, %c0_5] : memref<256x128xf32, #tpu.memory_space<vmem>>, vector<1x128xf32>
    %27 = arith.index_cast %c3_i32 : i32 to index
    %c0_6 = arith.constant 0 : index
    %28 = vector.load %arg3[%27, %c0_6] : memref<8x128xf32, #tpu.memory_space<vmem>>, vector<1x128xf32>
    tpu.vector_store %arg3[%27, %c0_6], %26 {strides = array<i32>} : memref<8x128xf32, #tpu.memory_space<vmem>>, vector<1x128xf32>,
    %c4_i32 = arith.constant 4 : i32
    %29 = arith.addi %0, %c4_i32 : i32
    %30 = arith.index_cast %29 : i32 to index
    %31 = memref.load %arg1[%30] : memref<16xi32, #tpu.memory_space<smem>>
    %32 = arith.index_cast %31 : i32 to index
    %c0_7 = arith.constant 0 : index
    %33 = vector.load %arg2[%32, %c0_7] : memref<256x128xf32, #tpu.memory_space<vmem>>, vector<1x128xf32>
    %34 = arith.index_cast %c4_i32 : i32 to index
    %c0_8 = arith.constant 0 : index
    %35 = vector.load %arg3[%34, %c0_8] : memref<8x128xf32, #tpu.memory_space<vmem>>, vector<1x128xf32>
    tpu.vector_store %arg3[%34, %c0_8], %33 {strides = array<i32>} : memref<8x128xf32, #tpu.memory_space<vmem>>, vector<1x128xf32>,
    %c5_i32 = arith.constant 5 : i32
    %36 = arith.addi %0, %c5_i32 : i32
    %37 = arith.index_cast %36 : i32 to index
    %38 = memref.load %arg1[%37] : memref<16xi32, #tpu.memory_space<smem>>
    %39 = arith.index_cast %38 : i32 to index
    %c0_9 = arith.constant 0 : index
    %40 = vector.load %arg2[%39, %c0_9] : memref<256x128xf32, #tpu.memory_space<vmem>>, vector<1x128xf32>
    %41 = arith.index_cast %c5_i32 : i32 to index
    %c0_10 = arith.constant 0 : index
    %42 = vector.load %arg3[%41, %c0_10] : memref<8x128xf32, #tpu.memory_space<vmem>>, vector<1x128xf32>
    tpu.vector_store %arg3[%41, %c0_10], %40 {strides = array<i32>} : memref<8x128xf32, #tpu.memory_space<vmem>>, vector<1x128xf32>,
    %c6_i32 = arith.constant 6 : i32
    %43 = arith.addi %0, %c6_i32 : i32
    %44 = arith.index_cast %43 : i32 to index
    %45 = memref.load %arg1[%44] : memref<16xi32, #tpu.memory_space<smem>>
    %46 = arith.index_cast %45 : i32 to index
    %c0_11 = arith.constant 0 : index
    %47 = vector.load %arg2[%46, %c0_11] : memref<256x128xf32, #tpu.memory_space<vmem>>, vector<1x128xf32>
    %48 = arith.index_cast %c6_i32 : i32 to index
    %c0_12 = arith.constant 0 : index
    %49 = vector.load %arg3[%48, %c0_12] : memref<8x128xf32, #tpu.memory_space<vmem>>, vector<1x128xf32>
    tpu.vector_store %arg3[%48, %c0_12], %47 {strides = array<i32>} : memref<8x128xf32, #tpu.memory_space<vmem>>, vector<1x128xf32>,
    %c7_i32 = arith.constant 7 : i32
    %50 = arith.addi %0, %c7_i32 : i32
    %51 = arith.index_cast %50 : i32 to index
    %52 = memref.load %arg1[%51] : memref<16xi32, #tpu.memory_space<smem>>
    %53 = arith.index_cast %52 : i32 to index
    %c0_13 = arith.constant 0 : index
    %54 = vector.load %arg2[%53, %c0_13] : memref<256x128xf32, #tpu.memory_space<vmem>>, vector<1x128xf32>
    %55 = arith.index_cast %c7_i32 : i32 to index
    %c0_14 = arith.constant 0 : index
    %56 = vector.load %arg3[%55, %c0_14] : memref<8x128xf32, #tpu.memory_space<vmem>>, vector<1x128xf32>
    tpu.vector_store %arg3[%55, %c0_14], %54 {strides = array<i32>} : memref<8x128xf32, #tpu.memory_space<vmem>>, vector<1x128xf32>,
    %c8_i32_15 = arith.constant 8 : i32
    return
  }
  func.func @transform_0(%arg0: i32, %arg1: memref<16xi32, #tpu.memory_space<smem>>) -> (i32, i32) {
    %c0_i32 = arith.constant 0 : i32
    %c0_i32_0 = arith.constant 0 : i32
    %c0_i32_1 = arith.constant 0 : i32
    return %c0_i32, %c0_i32_0 : i32, i32
  }
  func.func @transform_1(%arg0: i32, %arg1: memref<16xi32, #tpu.memory_space<smem>>) -> (i32, i32) {
    %c0_i32 = arith.constant 0 : i32
    %c0_i32_0 = arith.constant 0 : i32
    return %arg0, %c0_i32 : i32, i32
  }
}

</mosaic_0001>

<bundles_post_ra>
// kernel: tpu_custom_call.1
= control target key start
LH: loop header
LB: loop body
LE: loop exit
PB: predicated region body
PF: predicated region fallthrough
CT: control target
= control target key end

     0   :  { %s402_s9 = smov [#allocation3]   ;;  %s542_s0 = inlined_call_operand.hbm [shape: s32[16], index: 0, kind: input, shape index: {}]   ;;  %s543_s1 = inlined_call_operand.hbm [shape: f32[256,128], index: 1, kind: input, shape index: {}]   ;;  %s544_s2 = inlined_call_operand.hbm [shape: f32[16,128], index: 2, kind: output, shape index: {}]  }
   0x1   :  { %546 = sst [smem:[#allocation11_spill]] %s543_s1 }
   0x2   :  { %8 = dma.hbm_to_smem %s542_s0, 16, %s402_s9, [#allocation2] }
   0x3   :  { %376 = dma.done.wait [#allocation2], 16 }
   0x4   :  { %377 = vsyncadd [#allocation2], 4294967280 }
   0x5   :  { %10 = sfence }
   0x6   :  { %11 = vsyncpa [#allocation5], 0 }
   0x7   :  { %12 = vsyncpa [#allocation6], 0 }
   0x8   :  { %14 = vsyncpa [#allocation6 + $0x1], 0  ;;  %s425_s12 = smov 0   ;;  %s427_s13 = smov 0  }
   0x9   :  { %s429_s14 = smov 0   ;;  %s431_s15 = smov 0  }
   0xa LB: > { %s446_s0 = sadd.s32 4294967295, %s400_s15   ;;  %s236_s16 = sadd.s32 4294967294, %s400_s15   ;;  %s400_s15 = sphi %s431_s15, %s556_s15   ;;  %s396_s14 = sphi %s429_s14, %s555_s14   ;;  %s392_s13 = sphi %s427_s13, %s554_s13   ;;  %s388_s12 = sphi %s425_s12, %s553_s12  }
   0xb   : > { %s450_s17 = sadd.s32 1, %s400_s15   ;;  %s48_s18 = sadd.s32 1, %s396_s14 }
   0xc   : > { %s45_s19 = ssub.s32 %s400_s15, %s450_s17  ;;  %p58_p0 = scmp.ne.s32.totalorder %s396_s14, %s392_s13 }
   0xd   : > { %p46_p1 = scmp.eq.s32.totalorder %s45_s19, 0  ;;  %p59_p2 = scmp.eq.s32.totalorder %s446_s0, 1 }
   0xe   : > { %p64_p3 = scmp.ne.s32.totalorder %s392_s13, %s388_s12  ;;  %p65_p4 = scmp.eq.s32.totalorder %s236_s16, 1 }
   0xf   : > { %s461_s20 = scalar_select %p46_p1, %s396_s14, %s48_s18  }
  0x10   : > { %p463_p5 = por %p59_p2, %p58_p0  ;;  %p467_p6 = por %p65_p4, %p64_p3 }
  0x11   : > { %p237_p7 = scmp.ge.s32.totalorder %s400_s15, 1  ;;  %p72_p8 = scmp.lt.s32.totalorder %s400_s15, 3 }
  0x12   : > { %s548_s22 = scalar_select %p467_p6, 1, 0 }
  0x13   : > { %p261_p9 = scmp.eq.s32.totalorder %s446_s0, 0  ;;  %p474_p10 = pnand %p237_p7, %p72_p8 }
  0x14   : > { %s403_s24 = smov [#allocation4]  }
  0x15   : > { %s84_s25 = sshll.u32 %s403_s24, 4  ;;  %p253_p11 = pneg %p474_p10  ;;  %s85_s25 = int_to_ptr.vmem [resolvable:$true] %s84_s25 }
  0x16   : > { %s319_s26 = scalar_lea.vmem %s85_s25, 4096  ;;  %p327_p3 = scmp.lt.s32.totalorder %s85_s25, %s85_s25 }
  0x17   : > { %p254_p12 = pnand %p261_p9, %p253_p11  ;;  %p320_p0 = scmp.ne.s32.totalorder %s85_s25, %s319_s26 }
  0x18   : > { %p328_p4 = scmp.lt.s32.totalorder %s319_s26, %s319_s26 }
  0x19   : > { %p310_p13 = pneg %p254_p12 }
  0x1a   : > { %p329_p6 = por %p328_p4, %p327_p3 }
  0x1b   : > { %p322_p1 = pnand %p320_p0, %p310_p13 }
  0x1d   : > { %p323_p2 = pneg %p322_p1 }
  0x1f   : > { %p330_p7 = pnand %p329_p6, %p323_p2 }
  0x21   : > { %333 = shalt.err (!%p330_p7)
}
  0x22   : > { %s404_s27 = smov 128   ;;  %s405_s28 = smov 8  }
  0x23   : > { %s550_s1 = sld [smem:[#allocation11_spill]] }
  0x25   : > { %100 = sbr.rel (%p474_p10) target bundleno = 81 (0x51), region = 24 }
  0x29   : > { %256 = dma.hbm_to_vmem [thread:$0]  (!%p254_p12), %s550_s1, 4096, %s85_s25, [#allocation5], %s404_s27, %s404_s27, %s405_s28  }
  0x2a   : > { %379 = dma.done.wait (%p261_p9), [#allocation5], 4096  }
  0x2b   : > { %381 = vsyncadd (%p261_p9), [#allocation5], 4294963200  ;;  %s545_s3 = sand.u32 1, %s392_s13   ;;  %s242_s4 = sshll.u32 %s446_s0, 3 }
  0x2c   : > { %s241_s5 = sshll.u32 %s545_s3, 3  ;;  %s116_s6 = sld [smem:[#allocation3 + %s242_s4]] }
  0x2d   : > { %s120_s7 = sadd.s32 1, %s242_s4  ;;  %s125_s8 = sadd.s32 2, %s242_s4 }
  0x2e   : > { %s121_s9 = sld [smem:[#allocation3 + %s120_s7]]  ;;  %s130_s10 = sadd.s32 3, %s242_s4 }
  0x2f   : > { %s126_s11 = sld [smem:[#allocation3 + %s125_s8]]  ;;  %s135_s16 = sadd.s32 4, %s242_s4 }
  0x30   : > { %s131_s18 = sld [smem:[#allocation3 + %s130_s10]]  ;;  %s140_s19 = sadd.s32 5, %s242_s4 }
  0x31   : > { %s136_s23 = sld [smem:[#allocation3 + %s135_s16]]  ;;  %s145_s26 = sadd.s32 6, %s242_s4 }
  0x32   : > { %s117_s24 = scalar_lea.vmem [#allocation4], %s116_s6  ;;  %s141_s25 = sld [smem:[#allocation3 + %s140_s19]] }
  0x33   : > { %v118_v0 = vld [vmem:[%s117_s24] sm:$0x1]  ;;  %s114_s27 = scalar_lea.vmem [#allocation7], %s241_s5  ;;  %s146_s28 = sld [smem:[#allocation3 + %s145_s26]] }
  0x34   : > { %119 = vst [vmem:[%s114_s27] sm:$0x1] %v118_v0  ;;  %s150_s29 = sadd.s32 7, %s242_s4  ;;  %s122_s3 = scalar_lea.vmem [#allocation4], %s121_s9 }
  0x35   : > { %s151_s30 = sld [smem:[#allocation3 + %s150_s29]]  ;;  %v123_v1 = vld [vmem:[%s122_s3] sm:$0x1]  ;;  %s127_s7 = scalar_lea.vmem [#allocation4], %s126_s11 }
  0x36   : > { %124 = vst [vmem:[%s114_s27 + $0x1] sm:$0x1] %v123_v1  ;;  %v128_v2 = vld [vmem:[%s127_s7] sm:$0x1]  ;;  %s244_s8 = sshll.u32 %s446_s0, 7  ;;  %s132_s10 = scalar_lea.vmem [#allocation4], %s131_s18 }
  0x37   : > { %129 = vst [vmem:[%s114_s27 + $0x2] sm:$0x1] %v128_v2  ;;  %v133_v3 = vld [vmem:[%s132_s10] sm:$0x1]  ;;  %s169_s1 = sshll.u32 %s114_s27, 4  ;;  %s137_s6 = scalar_lea.vmem [#allocation4], %s136_s23  ;;  %s501_s1 = int_to_ptr.vmem [resolvable:$true] %s169_s1 }
  0x38   : > { %134 = vst [vmem:[%s114_s27 + $0x3] sm:$0x1] %v133_v3  ;;  %v138_v4 = vld [vmem:[%s137_s6] sm:$0x1]  ;;  %s142_s5 = scalar_lea.vmem [#allocation4], %s141_s25  ;;  %s499_s3 = scalar_lea.hbm %s544_s2, %s244_s8 }
  0x39   : > { %139 = vst [vmem:[%s114_s27 + $0x4] sm:$0x1] %v138_v4  ;;  %v143_v5 = vld [vmem:[%s142_s5] sm:$0x1]  ;;  %s147_s9 = scalar_lea.vmem [#allocation4], %s146_s28  ;;  %s551_s11 = sand.u32 1, %s392_s13  }
  0x3a   : > { %144 = vst [vmem:[%s114_s27 + $0x5] sm:$0x1] %v143_v5  ;;  %v148_v6 = vld [vmem:[%s147_s9] sm:$0x1]  ;;  %s156_s18 = scalar_lea.sflag [#allocation6], %s551_s11  ;;  %s334_s19 = scalar_lea.vmem %s501_s1, 128 }
  0x3b   : > { %149 = vst [vmem:[%s114_s27 + $0x6] sm:$0x1] %v148_v6  ;;  %s152_s0 = scalar_lea.vmem [#allocation4], %s151_s30  ;;  %p335_p6 = scmp.ne.s32.totalorder %s501_s1, %s334_s19 }
  0x3c   : > { %v153_v7 = vld [vmem:[%s152_s0] sm:$0x1]  ;;  %s406_s23 = smov [#allocation7]  }
  0x3d   : > { %154 = vst [vmem:[%s114_s27 + $0x7] sm:$0x1] %v153_v7  ;;  %p336_p8 = pnand %p335_p6, %p463_p5  ;;  %s338_s24 = sshll.u32 %s406_s23, 4  ;;  %s339_s24 = int_to_ptr.vmem [resolvable:$false] %s338_s24 }
  0x3e   : > { %s340_s25 = scalar_lea.vmem %s339_s24, 256  ;;  %p341_p10 = scmp.lt.s32.totalorder %s501_s1, %s339_s24 }
  0x3f   : > { %p337_p9 = pneg %p336_p8  ;;  %p342_p11 = scmp.lt.s32.totalorder %s340_s25, %s334_s19 }
  0x41   : > { %p343_p12 = por %p342_p11, %p341_p10 }
  0x43   : > { %p344_p13 = pnand %p343_p12, %p337_p9 }
  0x45   : > { %347 = shalt.err (!%p344_p13)
}
  0x46   : > { %s348_s26 = scalar_lea.hbm %s499_s3, 128  ;;  %s352_s29 = scalar_lea.hbm %s544_s2, 256 }
  0x47   : > { %p349_p0 = scmp.ne.s32.totalorder %s499_s3, %s348_s26  ;;  %p353_p3 = scmp.lt.s32.totalorder %s499_s3, %s544_s2 }
  0x48   : > { %p354_p4 = scmp.lt.s32.totalorder %s352_s29, %s348_s26 }
  0x49   : > { %p350_p1 = pnand %p349_p0, %p463_p5 }
  0x4a   : > { %p355_p7 = por %p354_p4, %p353_p3 }
  0x4b   : > { %p351_p2 = pneg %p350_p1 }
  0x4d   : > { %p356_p6 = pnand %p355_p7, %p351_p2 }
  0x4f   : > { %359 = shalt.err (!%p356_p6)
}
  0x50   : > { %251 = dma.vmem_to_hbm [thread:$0]  (%p463_p5), %s501_s1, 128, %s499_s3, %s156_s18  }
  0x51 PF: > { %p263_p8 = scmp.ge.s32.totalorder %s400_s15, 2  ;;  %s181_s8 = sand.u32 1, %s388_s12  }
  0x52   : > { %p552_p9 = scmp.ne.s32.totalorder %s548_s22, 0  ;;  %s182_s10 = scalar_lea.sflag [#allocation6], %s181_s8 }
  0x54   : > { %p258_p10 = pnand %p263_p8, %p552_p9 }
  0x56   : > { %p259_p11 = pneg %p258_p10 }
  0x58   : > { %383 = dma.done.wait (%p259_p11), %s182_s10, 128  }
  0x59   : > { %385 = vsyncadd (%p259_p11), %s182_s10, 4294967168  ;;  %p17_p12 = scmp.ge.s32.totalorder %s450_s17, 4   ;;  %s553_s12 = smov %s392_s13 }
  0x5a   : > { %s554_s13 = smov %s396_s14  ;;  %s555_s14 = smov %s461_s20 }
  0x5b   : > { %s556_s15 = smov %s450_s17  ;;  %19 = sbr.rel (!%p17_p12) target bundleno = 10 (0xa), region = 69 }
  0x60   :  { %187 = vsyncpa [#allocation5], 1 }
  0x61   :  { %189 = vsyncpa [#allocation5 + $0x1], 1 }
  0x62   :  { %190 = vsyncpa [#allocation6], 1 }
  0x63   :  { %192 = vsyncpa [#allocation6 + $0x1], 1 }

</bundles_post_ra>
